<compile_context>
chip_gen: v6e
topology: v6e:2x2x1
jax: 0.10.0
libtpu: 0.0.40
codegen_flags: <defaults>
</compile_context>

<pallas_src>
import jax
import jax.numpy as jnp
from jax.experimental import pallas as pl
from jax.experimental.pallas import tpu as pltpu

# ---- small, module-consistent sizes -------------------------------------
FEAT_DIM   = 640   # hard-coded in TransVG: nn.Linear(640, hidden_dim)
HIDDEN_DIM = 128   # args.vl_hidden_dim (small)
NUM_VISU   = 16    # stand-in for (imsize / divisor) ** 2 == 400 at small scale
NUM_TEXT   = 8     # args.max_query_len
BATCH      = 2
BOX_PAD    = 128   # lane-dense padding of the 4-wide bbox output


# ---------------------------------------------------------------------------
# Kernel 1: fused bbox head — visu_proj on the last visual token + 3-layer
# MLP + sigmoid, all VMEM-resident, gridless (tiny working set).
# ---------------------------------------------------------------------------
def _bbox_head_kernel(xlast_ref, vw_ref, vb_ref,
                      w1_ref, b1_ref, w2_ref, b2_ref, w3_ref, b3_ref,
                      box_ref):
    # x = visu_proj(last_visual_token)    (8pad, 640) bf16 @ (640, 128) bf16
    x = (jnp.dot(xlast_ref[...], vw_ref[...],
                 preferred_element_type=jnp.float32) + vb_ref[...])
    # pred_box = bbox_embed(x).sigmoid()  MLP(128, 128, 4, num_layers=3)
    z = jnp.maximum(
        jnp.dot(x, w1_ref[...], preferred_element_type=jnp.float32) + b1_ref[...],
        0.0)
    z = jnp.maximum(
        jnp.dot(z, w2_ref[...], preferred_element_type=jnp.float32) + b2_ref[...],
        0.0)
    y = jnp.dot(z, w3_ref[...], preferred_element_type=jnp.float32) + b3_ref[...]
    box_ref[...] = jax.nn.sigmoid(y).astype(box_ref.dtype)


def _bbox_head(x_pad_bf16, kp):
    sub = x_pad_bf16.shape[0]
    h = HIDDEN_DIM
    flops = 2 * sub * (FEAT_DIM * h + h * h + h * h + h * BOX_PAD)
    bytes_accessed = (sub * FEAT_DIM * 2 + FEAT_DIM * h * 2
                      + 2 * h * h * 4 + h * BOX_PAD * 4
                      + 4 * h * 4 + BOX_PAD * 4 + sub * BOX_PAD * 4)
    return pl.pallas_call(
        _bbox_head_kernel,
        out_shape=jax.ShapeDtypeStruct((sub, BOX_PAD), jnp.float32),
        cost_estimate=pl.CostEstimate(flops=flops,
                                      transcendentals=sub * BOX_PAD,
                                      bytes_accessed=bytes_accessed),
    )(x_pad_bf16, kp["visu_w"], kp["visu_b"],
      kp["mlp_w1"], kp["mlp_b1"], kp["mlp_w2"], kp["mlp_b2"],
      kp["mlp_w3"], kp["mlp_b3"])


# ---------------------------------------------------------------------------
# Kernel 2 (optional vl_src path): row-tiled linear projection
#   (rows, 640) bf16 @ (640, 128) bf16 + bias -> (rows, 128) f32
# Grid over row tiles, weights resident (constant index map), parallel axis.
# ---------------------------------------------------------------------------
def _proj_rows_kernel(x_ref, w_ref, b_ref, o_ref):
    o_ref[...] = (jnp.dot(x_ref[...], w_ref[...],
                          preferred_element_type=jnp.float32)
                  + b_ref[...]).astype(o_ref.dtype)


def _linear_rows(x2d, w_bf16, b_row, *, tm):
    rows, fan_in = x2d.shape
    h = w_bf16.shape[1]
    flops = 2 * rows * fan_in * h
    bytes_accessed = rows * fan_in * 2 + fan_in * h * 2 + h * 4 + rows * h * 4
    return pl.pallas_call(
        _proj_rows_kernel,
        out_shape=jax.ShapeDtypeStruct((rows, h), jnp.float32),
        grid=(pl.cdiv(rows, tm),),
        in_specs=[pl.BlockSpec((tm, fan_in), lambda i: (i, 0)),
                  pl.BlockSpec((fan_in, h), lambda i: (0, 0)),
                  pl.BlockSpec((1, h), lambda i: (0, 0))],
        out_specs=pl.BlockSpec((tm, h), lambda i: (i, 0)),
        compiler_params=pltpu.CompilerParams(
            dimension_semantics=("parallel",)),
        cost_estimate=pl.CostEstimate(flops=flops, transcendentals=0,
                                      bytes_accessed=bytes_accessed),
    )(x2d, w_bf16, b_row)


# ---------------------------------------------------------------------------
# Parameter init (deterministic, PyTorch nn.Linear default: U(+-1/sqrt(fan_in)))
# ---------------------------------------------------------------------------
def _init_linear(key, fan_in, fan_out):
    kw, kb = jax.random.split(key)
    bound = 1.0 / (fan_in ** 0.5)
    w = jax.random.uniform(kw, (fan_in, fan_out), jnp.float32, -bound, bound)
    b = jax.random.uniform(kb, (fan_out,), jnp.float32, -bound, bound)
    return w, b


def init_params(key):
    ks = jax.random.split(key, 5)
    p = {}
    p["visu_w"], p["visu_b"] = _init_linear(ks[0], FEAT_DIM, HIDDEN_DIM)
    p["text_w"], p["text_b"] = _init_linear(ks[1], FEAT_DIM, HIDDEN_DIM)
    p["mlp_w1"], p["mlp_b1"] = _init_linear(ks[2], HIDDEN_DIM, HIDDEN_DIM)
    p["mlp_w2"], p["mlp_b2"] = _init_linear(ks[3], HIDDEN_DIM, HIDDEN_DIM)
    p["mlp_w3"], p["mlp_b3"] = _init_linear(ks[4], HIDDEN_DIM, 4)
    return p


def prepare_kernel_params(params):
    """One-time weight preparation (hoisted out of the jitted forward):
    bf16 cast of the HBM-bandwidth-bound 640x128 projection weights,
    (1, H) bias rows, and lane-padding of the (H, 4) head to (H, 128)."""
    H = params["visu_w"].shape[1]
    return {
        "visu_w": params["visu_w"].astype(jnp.bfloat16),
        "visu_b": params["visu_b"].reshape(1, H),
        "text_w": params["text_w"].astype(jnp.bfloat16),
        "text_b": params["text_b"].reshape(1, H),
        "mlp_w1": params["mlp_w1"],
        "mlp_b1": params["mlp_b1"].reshape(1, H),
        "mlp_w2": params["mlp_w2"],
        "mlp_b2": params["mlp_b2"].reshape(1, H),
        "mlp_w3": jnp.zeros((H, BOX_PAD), jnp.float32).at[:, :4].set(
            params["mlp_w3"]),
        "mlp_b3": jnp.zeros((1, BOX_PAD), jnp.float32).at[:, :4].set(
            params["mlp_b3"].reshape(1, 4)),
    }


# ---------------------------------------------------------------------------
# TransVG.forward
# ---------------------------------------------------------------------------
def transvg_forward(visu_feat, text_feat, text_data_mask, kparams, *,
                    return_vl_src=False):
    """
    visu_feat:       (bs, NUM_VISU, 640)  -- stand-in for
                     WarperCLIP_V_T_RWKV_method(...)[0].view(bs, 400, 640)
    text_feat:       (bs, NUM_TEXT, 640)  -- stand-in for WarperCLIP_V_T_RWKV_text(...)
    text_data_mask:  (bs, NUM_TEXT) bool  -- text_data.mask
    kparams:         prepare_kernel_params(init_params(...))
    """
    bs, nv, _ = visu_feat.shape
    _, nt, _ = text_feat.shape
    H = HIDDEN_DIM

    # TODO(synk): RWKV-CLIP visual/text backbones are external modules; their
    # outputs are taken directly as inputs here.

    # text_mask = ~mask ; text_mask = text_mask.flatten(1)
    # (computed but never consumed downstream in the reference forward)
    text_mask = (~text_data_mask.astype(jnp.bool_)).reshape(bs, -1)
    del text_mask

    # TODO(synk): vl_rwkvREG (VL_RWKV regression stack) is an external RWKV
    # model; stubbed as identity, so vg_hs[-1] == last visual token's
    # projection -> only that row per batch feeds the bbox head.
    sub = max(8, -(-bs // 8) * 8)          # sublane-pad the tiny batch dim
    x_last = jnp.zeros((sub, FEAT_DIM), jnp.bfloat16).at[:bs].set(
        visu_feat[:, -1, :].astype(jnp.bfloat16))

    box_pad = _bbox_head(x_last, kparams)  # (sub, 128), lanes 4.. are padding
    pred_box = box_pad[:bs, :4]

    if not return_vl_src:
        return pred_box

    # Optional path for a future *real* VL_RWKV consumer: full visu/text
    # projections (row-tiled, pipelined, megacore-parallel) + token-major cat
    # exactly as torch.cat([text_src, visu_src], dim=0).
    tm_v = min(256, bs * nv)
    tm_t = min(256, bs * nt)
    visu_src = _linear_rows(visu_feat.reshape(-1, FEAT_DIM).astype(jnp.bfloat16),
                            kparams["visu_w"], kparams["visu_b"], tm=tm_v)
    text_src = _linear_rows(text_feat.reshape(-1, FEAT_DIM).astype(jnp.bfloat16),
                            kparams["text_w"], kparams["text_b"], tm=tm_t)
    visu_src = jnp.transpose(visu_src.reshape(bs, nv, H), (1, 0, 2))
    text_src = jnp.transpose(text_src.reshape(bs, nt, H), (1, 0, 2))
    vl_src = jnp.concatenate([text_src, visu_src], axis=0)   # (nt+nv, bs, H)
    return pred_box, vl_src


# ---------------------------------------------------------------------------
# Pure-JAX references (module semantics; optional bf16 input/weight rounding
# so the kernel can also be checked at tight tolerance)
# ---------------------------------------------------------------------------
def _reference_forward(visu_feat, text_feat, text_data_mask, params,
                       cast_bf16=False):
    vw, tw = params["visu_w"], params["text_w"]
    vfeat, tfeat = visu_feat, text_feat
    if cast_bf16:
        vw = vw.astype(jnp.bfloat16).astype(jnp.float32)
        tw = tw.astype(jnp.bfloat16).astype(jnp.float32)
        vfeat = vfeat.astype(jnp.bfloat16).astype(jnp.float32)
        tfeat = tfeat.astype(jnp.bfloat16).astype(jnp.float32)
    visu = jnp.transpose(vfeat, (1, 0, 2)) @ vw + params["visu_b"]
    text = tfeat @ tw + params["text_b"]
    text = jnp.transpose(text, (1, 0, 2))
    vl = jnp.concatenate([text, visu], axis=0)     # (nt+nv, bs, H)
    x = vl[-1]                                     # identity VL_RWKV stub
    h = jax.nn.relu(x @ params["mlp_w1"] + params["mlp_b1"])
    h = jax.nn.relu(h @ params["mlp_w2"] + params["mlp_b2"])
    y = h @ params["mlp_w3"] + params["mlp_b3"]
    return jax.nn.sigmoid(y), vl


# ---------------------------------------------------------------------------
if __name__ == "__main__":
    key = jax.random.PRNGKey(0)
    k_visu, k_text, k_params = jax.random.split(key, 3)

    visu_feat = jax.random.normal(k_visu, (BATCH, NUM_VISU, FEAT_DIM),
                                  dtype=jnp.float32)
    text_feat = jax.random.normal(k_text, (BATCH, NUM_TEXT, FEAT_DIM),
                                  dtype=jnp.float32)
    text_mask = jnp.zeros((BATCH, NUM_TEXT), dtype=jnp.bool_)

    params = init_params(k_params)
    kparams = prepare_kernel_params(params)     # one-time, outside the jit

    fwd = jax.jit(transvg_forward, static_argnames=("return_vl_src",))

    # Default (fast) path: pred_box only.
    pred_box = jax.block_until_ready(
        fwd(visu_feat, text_feat, text_mask, kparams, return_vl_src=False))

    ref_box_f32, ref_vl_f32 = _reference_forward(visu_feat, text_feat,
                                                 text_mask, params,
                                                 cast_bf16=False)
    ref_box_bf, ref_vl_bf = _reference_forward(visu_feat, text_feat,
                                               text_mask, params,
                                               cast_bf16=True)

    assert pred_box.shape == (BATCH, 4)
    assert pred_box.dtype == jnp.float32
    assert bool(jnp.all((pred_box >= 0.0) & (pred_box <= 1.0)))
    # Tight check vs. bf16-rounded reference (kernel correctness).
    assert bool(jnp.allclose(pred_box, ref_box_bf, atol=1e-4, rtol=1e-4))
    # Looser check vs. the f32 module reference (bf16 boundary cast).
    assert bool(jnp.allclose(pred_box, ref_box_f32, atol=2e-2, rtol=2e-2))

    # Optional vl_src path (full projections + token-major cat).
    pred_box2, vl_src = fwd(visu_feat, text_feat, text_mask, kparams,
                            return_vl_src=True)
    jax.block_until_ready((pred_box2, vl_src))

    assert vl_src.shape == (NUM_TEXT + NUM_VISU, BATCH, HIDDEN_DIM)
    assert bool(jnp.allclose(vl_src, ref_vl_bf, atol=1e-3, rtol=1e-3))
    assert bool(jnp.allclose(vl_src, ref_vl_f32, atol=3e-2, rtol=3e-2))
    assert bool(jnp.allclose(pred_box2, pred_box, atol=1e-6, rtol=1e-6))

    print("KERNEL_OK")
</pallas_src>

<mosaic_0001>
module attributes {stable_mosaic.version = 11 : i64} {
  func.func @_bbox_head_kernel(%arg0: memref<8x640xbf16, #tpu.memory_space<vmem>>, %arg1: memref<640x128xbf16, #tpu.memory_space<vmem>>, %arg2: memref<1x128xf32, #tpu.memory_space<vmem>>, %arg3: memref<128x128xf32, #tpu.memory_space<vmem>>, %arg4: memref<1x128xf32, #tpu.memory_space<vmem>>, %arg5: memref<128x128xf32, #tpu.memory_space<vmem>>, %arg6: memref<1x128xf32, #tpu.memory_space<vmem>>, %arg7: memref<128x128xf32, #tpu.memory_space<vmem>>, %arg8: memref<1x128xf32, #tpu.memory_space<vmem>>, %arg9: memref<8x128xf32, #tpu.memory_space<vmem>>) attributes {dimension_semantics = [], scalar_prefetch = 0 : i64, scratch_operands = 0 : i64, tpu.core_type = #tpu.core_type<tc>} {
    %c0 = arith.constant 0 : index
    %c0_0 = arith.constant 0 : index
    %0 = vector.load %arg0[%c0, %c0_0] : memref<8x640xbf16, #tpu.memory_space<vmem>>, vector<8x640xbf16>
    %c0_1 = arith.constant 0 : index
    %c0_2 = arith.constant 0 : index
    %1 = vector.load %arg1[%c0_1, %c0_2] : memref<640x128xbf16, #tpu.memory_space<vmem>>, vector<640x128xbf16>
    %cst = arith.constant dense<0.000000e+00> : vector<8x128xf32>
    %2 = tpu.matmul %0, %1, %cst {dimension_numbers = #tpu.dot_dimension_numbers<[1], [0], [0], [1], [0, 0, 1, 1], [], []>} : vector<8x640xbf16>, vector<640x128xbf16>, vector<8x128xf32> -> vector<8x128xf32>
    %c0_3 = arith.constant 0 : index
    %c0_4 = arith.constant 0 : index
    %3 = vector.load %arg2[%c0_3, %c0_4] : memref<1x128xf32, #tpu.memory_space<vmem>>, vector<1x128xf32>
    %4 = vector.broadcast %3 : vector<1x128xf32> to vector<8x128xf32>
    %5 = arith.addf %2, %4 : vector<8x128xf32>
    %c0_5 = arith.constant 0 : index
    %c0_6 = arith.constant 0 : index
    %6 = vector.load %arg3[%c0_5, %c0_6] : memref<128x128xf32, #tpu.memory_space<vmem>>, vector<128x128xf32>
    %cst_7 = arith.constant dense<0.000000e+00> : vector<8x128xf32>
    %7 = tpu.matmul %5, %6, %cst_7 {dimension_numbers = #tpu.dot_dimension_numbers<[1], [0], [0], [1], [0, 0, 1, 1], [], []>} : vector<8x128xf32>, vector<128x128xf32>, vector<8x128xf32> -> vector<8x128xf32>
    %c0_8 = arith.constant 0 : index
    %c0_9 = arith.constant 0 : index
    %8 = vector.load %arg4[%c0_8, %c0_9] : memref<1x128xf32, #tpu.memory_space<vmem>>, vector<1x128xf32>
    %9 = vector.broadcast %8 : vector<1x128xf32> to vector<8x128xf32>
    %10 = arith.addf %7, %9 : vector<8x128xf32>
    %cst_10 = arith.constant 0.000000e+00 : f32
    %11 = vector.broadcast %cst_10 : f32 to vector<8x128xf32>
    %12 = arith.maximumf %10, %11 : vector<8x128xf32>
    %c0_11 = arith.constant 0 : index
    %c0_12 = arith.constant 0 : index
    %13 = vector.load %arg5[%c0_11, %c0_12] : memref<128x128xf32, #tpu.memory_space<vmem>>, vector<128x128xf32>
    %cst_13 = arith.constant dense<0.000000e+00> : vector<8x128xf32>
    %14 = tpu.matmul %12, %13, %cst_13 {dimension_numbers = #tpu.dot_dimension_numbers<[1], [0], [0], [1], [0, 0, 1, 1], [], []>} : vector<8x128xf32>, vector<128x128xf32>, vector<8x128xf32> -> vector<8x128xf32>
    %c0_14 = arith.constant 0 : index
    %c0_15 = arith.constant 0 : index
    %15 = vector.load %arg6[%c0_14, %c0_15] : memref<1x128xf32, #tpu.memory_space<vmem>>, vector<1x128xf32>
    %16 = vector.broadcast %15 : vector<1x128xf32> to vector<8x128xf32>
    %17 = arith.addf %14, %16 : vector<8x128xf32>
    %cst_16 = arith.constant 0.000000e+00 : f32
    %18 = vector.broadcast %cst_16 : f32 to vector<8x128xf32>
    %19 = arith.maximumf %17, %18 : vector<8x128xf32>
    %c0_17 = arith.constant 0 : index
    %c0_18 = arith.constant 0 : index
    %20 = vector.load %arg7[%c0_17, %c0_18] : memref<128x128xf32, #tpu.memory_space<vmem>>, vector<128x128xf32>
    %cst_19 = arith.constant dense<0.000000e+00> : vector<8x128xf32>
    %21 = tpu.matmul %19, %20, %cst_19 {dimension_numbers = #tpu.dot_dimension_numbers<[1], [0], [0], [1], [0, 0, 1, 1], [], []>} : vector<8x128xf32>, vector<128x128xf32>, vector<8x128xf32> -> vector<8x128xf32>
    %c0_20 = arith.constant 0 : index
    %c0_21 = arith.constant 0 : index
    %22 = vector.load %arg8[%c0_20, %c0_21] : memref<1x128xf32, #tpu.memory_space<vmem>>, vector<1x128xf32>
    %23 = vector.broadcast %22 : vector<1x128xf32> to vector<8x128xf32>
    %24 = arith.addf %21, %23 : vector<8x128xf32>
    %25 = arith.negf %24 : vector<8x128xf32>
    %26 = math.exp %25 : vector<8x128xf32>
    %cst_22 = arith.constant 1.000000e+00 : f32
    %27 = vector.broadcast %cst_22 : f32 to vector<8x128xf32>
    %28 = arith.addf %27, %26 : vector<8x128xf32>
    %29 = arith.divf %27, %28 : vector<8x128xf32>
    %c0_23 = arith.constant 0 : index
    %c0_24 = arith.constant 0 : index
    %30 = vector.load %arg9[%c0_23, %c0_24] : memref<8x128xf32, #tpu.memory_space<vmem>>, vector<8x128xf32>
    tpu.vector_store %arg9[%c0_23, %c0_24], %29 {strides = array<i32>} : memref<8x128xf32, #tpu.memory_space<vmem>>, vector<8x128xf32>,
    return
  }
}

</mosaic_0001>

<bundles_post_ra>
// kernel: transvg_forward.1
= control target key start
LH: loop header
LB: loop body
LE: loop exit
PB: predicated region body
PF: predicated region fallthrough
CT: control target
= control target key end

     0   :  { %14 = vsyncpa [#allocation3], 0  ;;  %s1444_s0 = inlined_call_operand.vmem [shape: bf16[8,640], index: 0, kind: input, shape index: {}]   ;;  %s1445_s1 = inlined_call_operand.hbm [shape: bf16[640,128], index: 1, kind: input, shape index: {}]   ;;  %s1446_s2 = inlined_call_operand.vmem [shape: f32[1,128], index: 2, kind: input, shape index: {}]   ;;  %s1447_s3 = inlined_call_operand.hbm [shape: f32[128,128], index: 3, kind: input, shape index: {}]   ;;  %s1448_s4 = inlined_call_operand.vmem [shape: f32[1,128], index: 4, kind: input, shape index: {}]   ;;  %s1449_s5 = inlined_call_operand.hbm [shape: f32[128,128], index: 5, kind: input, shape index: {}]   ;;  %s1450_s6 = inlined_call_operand.vmem [shape: f32[1,128], index: 6, kind: input, shape index: {}]   ;;  %s1451_s7 = inlined_call_operand.hbm [shape: f32[128,128], index: 7, kind: input, shape index: {}]   ;;  %s1452_s8 = inlined_call_operand.vmem [shape: f32[1,128], index: 8, kind: input, shape index: {}]   ;;  %s1453_s9 = inlined_call_operand.vmem [shape: f32[8,128], index: 9, kind: output, shape index: {}]  }
   0x1   :  { %15 = vsyncpa [#allocation5], 0 }
   0x2   :  { %16 = vsyncpa [#allocation8], 0  ;;  %s1275_s30 = smov [#allocation4]  }
   0x3   :  { %s38_s10 = sshll.u32 %s1275_s30, 4  ;;  %s39_s10 = int_to_ptr.vmem [resolvable:$true] %s38_s10 }
   0x4   :  { %s1197_s11 = scalar_lea.vmem %s39_s10, 2048  ;;  %p1202_p1 = scmp.lt.s32.totalorder %s39_s10, %s39_s10 }
   0x5   :  { %p1198_p0 = scmp.ne.s32.totalorder %s39_s10, %s1197_s11  ;;  %p1203_p2 = scmp.lt.s32.totalorder %s1197_s11, %s1197_s11 }
   0x7   :  { %p1204_p3 = por %p1203_p2, %p1202_p1 }
   0x9   :  { %p1205_p4 = pnand %p1204_p3, %p1198_p0 }
   0xb   :  { %1208 = shalt.err (!%p1205_p4)
}
   0xc   :  { %s1276_s12 = smov 128   ;;  %s1277_s13 = smov 8  }
   0xd   :  { %44 = dma.hbm_to_vmem [thread:$0]  %s1447_s3, 2048, %s39_s10, [#allocation5], %s1276_s12, %s1276_s12, %s1277_s13  }
   0xe   :  { %s1278_s16 = smov [#allocation2]  }
   0xf   :  { %s24_s17 = sshll.u32 %s1278_s16, 4  ;;  %s25_s17 = int_to_ptr.vmem [resolvable:$true] %s24_s17 }
  0x10   :  { %s1217_s18 = scalar_lea.vmem %s25_s17, 5120  ;;  %p1222_p6 = scmp.lt.s32.totalorder %s25_s17, %s25_s17 }
  0x11   :  { %p1218_p5 = scmp.ne.s32.totalorder %s25_s17, %s1217_s18  ;;  %p1223_p7 = scmp.lt.s32.totalorder %s1217_s18, %s1217_s18 }
  0x13   :  { %p1224_p8 = por %p1223_p7, %p1222_p6 }
  0x15   :  { %p1225_p9 = pnand %p1224_p8, %p1218_p5 }
  0x17   :  { %1228 = shalt.err (!%p1225_p9)
}
  0x18   :  { %s1279_s19 = smov 64   ;;  %s1280_s20 = smov 4  }
  0x19   :  { %30 = dma.hbm_to_vmem [thread:$0]  %s1445_s1, 5120, %s25_s17, [#allocation3], %s1279_s19, %s1279_s19, %s1280_s20  }
  0x1a   :  { %s1281_s23 = smov [#allocation6]   ;;  %s1282_s25 = smov [#allocation7]  }
  0x1b   :  { %s52_s24 = sshll.u32 %s1281_s23, 4  ;;  %s66_s3 = sshll.u32 %s1282_s25, 4  ;;  %s53_s24 = int_to_ptr.vmem [resolvable:$true] %s52_s24  ;;  %s67_s3 = int_to_ptr.vmem [resolvable:$true] %s66_s3 }
  0x1c   :  { %s1237_s26 = scalar_lea.vmem %s53_s24, 2048  ;;  %p1242_p11 = scmp.lt.s32.totalorder %s53_s24, %s53_s24 }
  0x1d   :  { %p1238_p10 = scmp.ne.s32.totalorder %s53_s24, %s1237_s26  ;;  %p1243_p12 = scmp.lt.s32.totalorder %s1237_s26, %s1237_s26 }
  0x1f   :  { %p1244_p13 = por %p1243_p12, %p1242_p11 }
  0x21   :  { %p1245_p0 = pnand %p1244_p13, %p1238_p10 }
  0x23   :  { %1248 = shalt.err (!%p1245_p0)
}
  0x24   :  { %58 = dma.hbm_to_vmem [thread:$0]  %s1449_s5, 2048, %s53_s24, [#allocation5], %s1276_s12, %s1276_s12, %s1277_s13  }
  0x25   :  { %s1257_s1 = scalar_lea.vmem %s67_s3, 2048  ;;  %p1262_p2 = scmp.lt.s32.totalorder %s67_s3, %s67_s3 }
  0x26   :  { %p1258_p1 = scmp.ne.s32.totalorder %s67_s3, %s1257_s1  ;;  %p1263_p3 = scmp.lt.s32.totalorder %s1257_s1, %s1257_s1 }
  0x28   :  { %p1264_p4 = por %p1263_p3, %p1262_p2 }
  0x2a   :  { %p1265_p5 = pnand %p1264_p4, %p1258_p1 }
  0x2c   :  { %1268 = shalt.err (!%p1265_p5)
}
  0x2d   :  { %72 = dma.hbm_to_vmem [thread:$0]  %s1451_s7, 2048, %s67_s3, [#allocation8], %s1276_s12, %s1276_s12, %s1277_s13  }
  0x2e   :  { %1269 = dma.done.wait [#allocation3], 5120  }
  0x2f   :  { %1270 = vsyncadd [#allocation3], 4294962176 }
  0x30   :  { %1271 = dma.done.wait [#allocation5], 4096  }
  0x31   :  { %1272 = vsyncadd [#allocation5], 4294963200 }
  0x32   :  { %1273 = dma.done.wait [#allocation8], 2048  }
  0x33   :  { %1274 = vsyncadd [#allocation8], 4294965248  ;;  %v1140_v0 = vld [vmem:[#allocation2 + $0x78] sm:$0xff]   ;;  %v1144_v4 = vld [vmem:[#allocation2 + $0x70] sm:$0xff]   ;;  %v1283_v35 = vmov 0.0   ;;  %vm1284_vm0 = vmmov 0  }
  0x34   :  { %v1141_v1 = vld [vmem:[#allocation2 + $0x38] sm:$0xff]   ;;  %901 = vmatprep.subr.bf16.mxu0 %v1140_v0  ;;  %v1145_v5 = vld [vmem:[#allocation2 + $0x30] sm:$0xff]   ;;  %v1148_v8 = vld [vmem:[#allocation2 + $0x68] sm:$0xff]  }
  0x35   :  { %v1142_v2 = vld [vmem:[#allocation2 + $0xf8] sm:$0xff]   ;;  %902 = vmatpush3.bf16.msra.mxu0 %v1141_v1  ;;  %v1146_v6 = vld [vmem:[#allocation2 + $0xf0] sm:$0xff]   ;;  %v1149_v9 = vld [vmem:[#allocation2 + $0x28] sm:$0xff]  }
  0x36   :  { %v1143_v3 = vld [vmem:[#allocation2 + $0xb8] sm:$0xff]   ;;  %923 = vmatprep.subr.bf16.mxu1 %v1142_v2  ;;  %903 = vmatprep.subr.bf16.mxu0 %v1144_v4  ;;  %v1147_v7 = vld [vmem:[#allocation2 + $0xb0] sm:$0xff]   ;;  %v1150_v10 = vld [vmem:[#allocation2 + $0xe8] sm:$0xff]  }
  0x37   :  { %924 = vmatpush3.bf16.msra.mxu1 %v1143_v3  ;;  %v1151_v11 = vld [vmem:[#allocation2 + $0xa8] sm:$0xff]   ;;  %v1152_v12 = vld [vmem:[#allocation2 + $0x60] sm:$0xff]   ;;  %v1156_v16 = vld [vmem:[#allocation2 + $0x58] sm:$0xff]  }
  0x38   :  { %925 = vmatprep.subr.bf16.mxu1 %v1146_v6  ;;  %v1153_v13 = vld [vmem:[#allocation2 + $0x20] sm:$0xff]   ;;  %v1157_v17 = vld [vmem:[#allocation2 + $0x18] sm:$0xff]   ;;  %v1160_v20 = vld [vmem:[#allocation2 + $0x50] sm:$0xff]  }
  0x39   :  { %904 = vmatpush3.bf16.msra.mxu0 %v1145_v5  ;;  %v1154_v14 = vld [vmem:[#allocation2 + $0xe0] sm:$0xff]   ;;  %v1158_v18 = vld [vmem:[#allocation2 + $0xd8] sm:$0xff]   ;;  %v1161_v21 = vld [vmem:[#allocation2 + $0x10] sm:$0xff]  }
  0x3a   :  { %905 = vmatprep.subr.bf16.mxu0 %v1148_v8  ;;  %v1155_v15 = vld [vmem:[#allocation2 + $0xa0] sm:$0xff]   ;;  %v1159_v19 = vld [vmem:[#allocation2 + $0x98] sm:$0xff]   ;;  %v1162_v22 = vld [vmem:[#allocation2 + $0xd0] sm:$0xff]  }
  0x3b   :  { %926 = vmatpush3.bf16.msra.mxu1 %v1147_v7  ;;  %v1163_v23 = vld [vmem:[#allocation2 + $0x90] sm:$0xff]   ;;  %v1164_v24 = vld [vmem:[#allocation2 + $0x48] sm:$0xff]   ;;  %v1168_v28 = vld [vmem:[#allocation2 + $0x40] sm:$0xff]  }
  0x3c   :  { %927 = vmatprep.subr.bf16.mxu1 %v1150_v10  ;;  %v1165_v25 = vld [vmem:[#allocation2 + $0x8] sm:$0xff]   ;;  %v1169_v29 = vld [vmem:[#allocation2] sm:$0xff]   ;;  %v1176_v39 = vld [vmem:[#allocation2 + $0x138] sm:$0xff]  }
  0x3d   :  { %906 = vmatpush3.bf16.msra.mxu0 %v1149_v9  ;;  %v1166_v26 = vld [vmem:[#allocation2 + $0xc8] sm:$0xff]   ;;  %v1170_v30 = vld [vmem:[#allocation2 + $0xc0] sm:$0xff]   ;;  %v1177_v40 = vld [vmem:[#allocation2 + $0x130] sm:$0xff]  }
  0x3e   :  { %907 = vmatprep.subr.bf16.mxu0 %v1152_v12  ;;  %v1167_v27 = vld [vmem:[#allocation2 + $0x88] sm:$0xff]   ;;  %v88_v31 = vld [vmem:[%s1444_s0] sm:$0xff]  ;;  %v1180_v43 = vld [vmem:[#allocation2 + $0x118] sm:$0xff]  }
  0x3f   :  { %928 = vmatpush3.bf16.msra.mxu1 %v1151_v11  ;;  %v852_v32 = vcombine.low %v88_v31, %v88_v31  ;;  %v853_v33 = vcombine.high %v88_v31, %v88_v31  ;;  %v1173_v34 = vld [vmem:[#allocation2 + $0x80] sm:$0xff]   ;;  %v89_v36 = vld [vmem:[%s1444_s0 + $0x8] sm:$0xff]  ;;  %v1181_v44 = vld [vmem:[#allocation2 + $0x110] sm:$0xff]  }
  0x40   :  { %929 = vmatprep.subr.bf16.mxu1 %v1154_v14  ;;  %v854_v37 = vcombine.low %v89_v36, %v89_v36  ;;  %v855_v38 = vcombine.high %v89_v36, %v89_v36  ;;  %v1178_v41 = vld [vmem:[#allocation2 + $0x128] sm:$0xff]   ;;  %v1179_v42 = vld [vmem:[#allocation2 + $0x120] sm:$0xff]   ;;  %v1184_v47 = vld [vmem:[%s1444_s0 + $0x10] ss:$0 sps:$4 sm:$0xff]  }
  0x41   :  { %908 = vmatpush3.bf16.msra.mxu0 %v1153_v13  ;;  %468 = vmatprep.mubr.bf16.mxu0 %v853_v33  ;;  %v1182_v45 = vld [vmem:[#allocation2 + $0x108] sm:$0xff]   ;;  %v1183_v46 = vld [vmem:[#allocation2 + $0x100] sm:$0xff]   ;;  %v571_v48 = vld [vmem:[#allocation4 + $0x78] sm:$0xff] }
  0x42   :  { %909 = vmatprep.subr.bf16.mxu0 %v1156_v16  ;;  %508 = vmatprep.mubr.bf16.mxu1 %v855_v38  ;;  %v570_v49 = vld [vmem:[#allocation4 + $0x70] sm:$0xff]  ;;  %v569_v50 = vld [vmem:[#allocation4 + $0x68] sm:$0xff]  ;;  %v568_v51 = vld [vmem:[#allocation4 + $0x60] sm:$0xff] }
  0x43   :  { %930 = vmatpush3.bf16.msra.mxu1 %v1155_v15  ;;  %v567_v52 = vld [vmem:[#allocation4 + $0x58] sm:$0xff]  ;;  %v566_v53 = vld [vmem:[#allocation4 + $0x50] sm:$0xff]  ;;  %v565_v54 = vld [vmem:[#allocation4 + $0x48] sm:$0xff] }
  0x44   :  { %931 = vmatprep.subr.bf16.mxu1 %v1158_v18  ;;  %v564_v55 = vld [vmem:[#allocation4 + $0x40] sm:$0xff]  ;;  %v563_v56 = vld [vmem:[#allocation4 + $0x38] sm:$0xff]  ;;  %v562_v57 = vld [vmem:[#allocation4 + $0x30] sm:$0xff] }
  0x45   :  { %910 = vmatpush3.bf16.msra.mxu0 %v1157_v17  ;;  %v561_v58 = vld [vmem:[#allocation4 + $0x28] sm:$0xff]  ;;  %v560_v59 = vld [vmem:[#allocation4 + $0x20] sm:$0xff]  ;;  %v559_v60 = vld [vmem:[#allocation4 + $0x18] sm:$0xff] }
  0x46   :  { %911 = vmatprep.subr.bf16.mxu0 %v1160_v20  ;;  %v558_v61 = vld [vmem:[#allocation4 + $0x10] sm:$0xff]  ;;  %v557_v62 = vld [vmem:[#allocation4 + $0x8] sm:$0xff]  ;;  %v556_v63 = vld [vmem:[#allocation4] sm:$0xff] }
  0x47   :  { %932 = vmatpush3.bf16.msra.mxu1 %v1159_v19  ;;  %v665_v0 = vld [vmem:[#allocation6 + $0x78] sm:$0xff]  ;;  %v664_v1 = vld [vmem:[#allocation6 + $0x70] sm:$0xff]  ;;  %v663_v2 = vld [vmem:[#allocation6 + $0x68] sm:$0xff] }
  0x48   :  { %933 = vmatprep.subr.bf16.mxu1 %v1162_v22  ;;  %v662_v3 = vld [vmem:[#allocation6 + $0x60] sm:$0xff]  ;;  %v661_v4 = vld [vmem:[#allocation6 + $0x58] sm:$0xff]  ;;  %v660_v5 = vld [vmem:[#allocation6 + $0x50] sm:$0xff] }
  0x49   :  { %912 = vmatpush3.bf16.msra.mxu0 %v1161_v21  ;;  %v659_v6 = vld [vmem:[#allocation6 + $0x48] sm:$0xff]  ;;  %v658_v7 = vld [vmem:[#allocation6 + $0x40] sm:$0xff]  ;;  %v657_v8 = vld [vmem:[#allocation6 + $0x38] sm:$0xff] }
  0x4a   :  { %913 = vmatprep.subr.bf16.mxu0 %v1164_v24  ;;  %v656_v9 = vld [vmem:[#allocation6 + $0x30] sm:$0xff]  ;;  %v655_v10 = vld [vmem:[#allocation6 + $0x28] sm:$0xff]  ;;  %v654_v11 = vld [vmem:[#allocation6 + $0x20] sm:$0xff] }
  0x4b   :  { %934 = vmatpush3.bf16.msra.mxu1 %v1163_v23  ;;  %v653_v12 = vld [vmem:[#allocation6 + $0x18] sm:$0xff]  ;;  %v851_v22 = vld [vmem:[%s1446_s2] ss:$0 sm:$0xff]  ;;  %v652_v31 = vld [vmem:[#allocation6 + $0x10] sm:$0xff] }
  0x4c   :  { %935 = vmatprep.subr.bf16.mxu1 %v1166_v26  ;;  %v650_v33 = vld [vmem:[#allocation6] sm:$0xff]  ;;  %v758_v36 = vld [vmem:[#allocation7 + $0x70] sm:$0xff] }
  0x4d   :  { %914 = vmatpush3.bf16.msra.mxu0 %v1165_v25  ;;  %v756_v38 = vld [vmem:[#allocation7 + $0x60] sm:$0xff] }
  0x4e   :  { %915 = vmatprep.subr.bf16.mxu0 %v1168_v28 }
  0x4f   :  { %936 = vmatpush3.bf16.msra.mxu1 %v1167_v27 }
  0x50   :  { %937 = vmatprep.subr.bf16.mxu1 %v1170_v30 }
  0x51   :  { %916 = vmatpush3.bf16.msra.mxu0 %v1169_v29 }
  0x52   :  { %1005 = vmatprep.subr.bf16.mxu0 %v1283_v35 }
  0x53   :  { %938 = vmatpush3.bf16.msra.mxu1 %v1173_v34  ;;  %v759_v34 = vld [vmem:[#allocation7 + $0x78] sm:$0xff] }
  0x54   :  { %469 = vmatmul.mubr.bf16.vlgmr.msra.gmra.mxu0 %v852_v32  ;;  %1025 = vmatprep.subr.mxu1 %v1283_v35  ;;  %v651_v32 = vld [vmem:[#allocation6 + $0x8] sm:$0xff] }
  0x55   :  { %1006 = vmatpush3.bf16.msra.mxu0 %v1176_v39  ;;  %1021 = vmatprep.mubr.msk.bf16.mxu0 %vm1284_vm0, %v1283_v35  ;;  %v755_v39 = vld [vmem:[#allocation7 + $0x58] sm:$0xff] }
  0x56   :  { %509 = vmatmul.mubr.bf16.vlgmr.msra.gmra.mxu1 %v854_v37  ;;  %1007 = vmatprep.subr.bf16.mxu0 %v1283_v35  ;;  %v757_v37 = vld [vmem:[#allocation7 + $0x68] sm:$0xff] }
  0x57   :  { %1057 = vmatprep.mubr.msk.f32.mxu1 %vm1284_vm0, %v1283_v35  ;;  %1026 = vmatpush3.msra.mxu1 %v571_v48  ;;  %v897_v48 = vld [vmem:[%s1448_s4] ss:$0 sm:$0xff] }
  0x58   :  { %1027 = vmatprep.subr.mxu1 %v1283_v35 }
  0x59   :  { %1008 = vmatpush3.bf16.msra.mxu0 %v1177_v40  ;;  %1028 = vmatpush3.msra.mxu1 %v570_v49  ;;  %v754_v40 = vld [vmem:[#allocation7 + $0x50] sm:$0xff] }
  0x5a   :  { %1009 = vmatprep.subr.bf16.mxu0 %v1283_v35  ;;  %1029 = vmatprep.subr.mxu1 %v1283_v35 }
  0x5b   :  { %1030 = vmatpush3.msra.mxu1 %v569_v50 }
  0x5c   :  { %1031 = vmatprep.subr.mxu1 %v1283_v35 }
  0x5d   :  { %1010 = vmatpush3.bf16.msra.mxu0 %v1178_v41  ;;  %1032 = vmatpush3.msra.mxu1 %v568_v51  ;;  %v753_v41 = vld [vmem:[#allocation7 + $0x48] sm:$0xff] }
  0x5e   :  { %1011 = vmatprep.subr.bf16.mxu0 %v1283_v35  ;;  %1033 = vmatprep.subr.mxu1 %v1283_v35 }
  0x5f   :  { %1034 = vmatpush3.msra.mxu1 %v567_v52 }
  0x60   :  { %1035 = vmatprep.subr.mxu1 %v1283_v35 }
  0x61   :  { %1012 = vmatpush3.bf16.msra.mxu0 %v1179_v42  ;;  %1036 = vmatpush3.msra.mxu1 %v566_v53  ;;  %v752_v42 = vld [vmem:[#allocation7 + $0x40] sm:$0xff]  ;;  %v746_v53 = vld [vmem:[#allocation7 + $0x10] sm:$0xff] }
  0x62   :  { %1013 = vmatprep.subr.bf16.mxu0 %v1283_v35  ;;  %1037 = vmatprep.subr.mxu1 %v1283_v35 }
  0x63   :  { %1038 = vmatpush3.msra.mxu1 %v565_v54  ;;  %v745_v54 = vld [vmem:[#allocation7 + $0x8] sm:$0xff] }
  0x64   :  { %1039 = vmatprep.subr.mxu1 %v1283_v35 }
  0x65   :  { %1014 = vmatpush3.bf16.msra.mxu0 %v1180_v43  ;;  %1040 = vmatpush3.msra.mxu1 %v564_v55  ;;  %v751_v43 = vld [vmem:[#allocation7 + $0x38] sm:$0xff]  ;;  %v744_v55 = vld [vmem:[#allocation7] sm:$0xff] }
  0x66   :  { %1015 = vmatprep.subr.bf16.mxu0 %v1283_v35  ;;  %1041 = vmatprep.subr.mxu1 %v1283_v35 }
  0x67   :  { %1042 = vmatpush3.msra.mxu1 %v563_v56  ;;  %v898_v56 = vld [vmem:[%s1450_s6] ss:$0 sm:$0xff] }
  0x68   :  { %1043 = vmatprep.subr.mxu1 %v1283_v35 }
  0x69   :  { %1016 = vmatpush3.bf16.msra.mxu0 %v1181_v44  ;;  %1044 = vmatpush3.msra.mxu1 %v562_v57  ;;  %v750_v44 = vld [vmem:[#allocation7 + $0x30] sm:$0xff] }
  0x6a   :  { %1017 = vmatprep.subr.bf16.mxu0 %v1283_v35  ;;  %1045 = vmatprep.subr.mxu1 %v1283_v35 }
  0x6b   :  { %1046 = vmatpush3.msra.mxu1 %v561_v58 }
  0x6c   :  { %1047 = vmatprep.subr.mxu1 %v1283_v35 }
  0x6d   :  { %1018 = vmatpush3.bf16.msra.mxu0 %v1182_v45  ;;  %1048 = vmatpush3.msra.mxu1 %v560_v59  ;;  %v749_v45 = vld [vmem:[#allocation7 + $0x28] sm:$0xff] }
  0x6e   :  { %1019 = vmatprep.subr.bf16.mxu0 %v1283_v35  ;;  %1049 = vmatprep.subr.mxu1 %v1283_v35 }
  0x6f   :  { %1050 = vmatpush3.msra.mxu1 %v559_v60 }
  0x70   :  { %1051 = vmatprep.subr.mxu1 %v1283_v35 }
  0x71   :  { %1020 = vmatpush3.bf16.msra.mxu0 %v1183_v46  ;;  %1052 = vmatpush3.msra.mxu1 %v558_v61  ;;  %v748_v46 = vld [vmem:[#allocation7 + $0x20] sm:$0xff] }
  0x72   :  { %1060 = vmatprep.subr.mxu0 %v1283_v35  ;;  %1053 = vmatprep.subr.mxu1 %v1283_v35  ;;  %v899_v61 = vld [vmem:[%s1452_s8] ss:$0 sm:$0xff] }
  0x73   :  { %1054 = vmatpush3.msra.mxu1 %v557_v62 }
  0x74   :  { %1022 = vmatmul.mubr.bf16.vlgmr.msra.gmra.mxu0 %v1184_v47  ;;  %1055 = vmatprep.subr.mxu1 %v1283_v35  ;;  %v747_v47 = vld [vmem:[#allocation7 + $0x18] sm:$0xff] }
  0x75   :  { %1092 = vmatprep.mubr.msk.f32.mxu0 %vm1284_vm0, %v1283_v35  ;;  %1056 = vmatpush3.msra.mxu1 %v556_v63 }
  0x76   :  { %1095 = vmatprep.subr.mxu1 %v1283_v35  ;;  %1061 = vmatpush3.msra.mxu0 %v665_v0 }
  0x77   :  { %1062 = vmatprep.subr.mxu0 %v1283_v35 }
  0x78   :  { %1063 = vmatpush3.msra.mxu0 %v664_v1 }
  0x79   :  { %1064 = vmatprep.subr.mxu0 %v1283_v35 }
  0x7a   :  { %1065 = vmatpush3.msra.mxu0 %v663_v2 }
  0x7b   :  { %1066 = vmatprep.subr.mxu0 %v1283_v35 }
  0x7c   :  { %1067 = vmatpush3.msra.mxu0 %v662_v3 }
  0x7d   :  { %1068 = vmatprep.subr.mxu0 %v1283_v35 }
  0x7e   :  { %1069 = vmatpush3.msra.mxu0 %v661_v4 }
  0x7f   :  { %1070 = vmatprep.subr.mxu0 %v1283_v35 }
  0x80   :  { %1071 = vmatpush3.msra.mxu0 %v660_v5 }
  0x81   :  { %1072 = vmatprep.subr.mxu0 %v1283_v35 }
  0x82   :  { %1073 = vmatpush3.msra.mxu0 %v659_v6 }
  0x83   :  { %1074 = vmatprep.subr.mxu0 %v1283_v35 }
  0x84   :  { %1075 = vmatpush3.msra.mxu0 %v658_v7 }
  0x85   :  { %1076 = vmatprep.subr.mxu0 %v1283_v35 }
  0x86   :  { %1077 = vmatpush3.msra.mxu0 %v657_v8 }
  0x87   :  { %1078 = vmatprep.subr.mxu0 %v1283_v35 }
  0x88   :  { %1079 = vmatpush3.msra.mxu0 %v656_v9 }
  0x89   :  { %1080 = vmatprep.subr.mxu0 %v1283_v35 }
  0x8a   :  { %1081 = vmatpush3.msra.mxu0 %v655_v10 }
  0x8b   :  { %1082 = vmatprep.subr.mxu0 %v1283_v35 }
  0x8c   :  { %1083 = vmatpush3.msra.mxu0 %v654_v11 }
  0x8d   :  { %1084 = vmatprep.subr.mxu0 %v1283_v35 }
  0x8e   :  { %1085 = vmatpush3.msra.mxu0 %v653_v12 }
  0x8f   :  { %1086 = vmatprep.subr.mxu0 %v1283_v35 }
  0x90   :  { %1087 = vmatpush3.msra.mxu0 %v652_v31 }
  0x91   :  { %1088 = vmatprep.subr.mxu0 %v1283_v35 }
  0x92   :  { %1089 = vmatpush3.msra.mxu0 %v651_v32 }
  0x93   :  { %1090 = vmatprep.subr.mxu0 %v1283_v35 }
  0x94   :  { %1091 = vmatpush3.msra.mxu0 %v650_v33 }
 0x114   :  { %v917_v13 = vpop.f32.mrf.mxu0 }
 0x116   :  { %v918_v14 = vpop.f32.mrf.mxu0  ;;  %v939_v15 = vpop.f32.mrf.mxu1 }
 0x117   :  { %v919_v21 = vadd.f32 %v918_v14, %v917_v13 }
 0x118   :  { %v920_v16 = vpop.f32.mrf.mxu0  ;;  %v940_v17 = vpop.f32.mrf.mxu1 }
 0x119   :  { %v471_v23 = vadd.f32 %v919_v21, %v851_v22  ;;  %v941_v24 = vadd.f32 %v940_v17, %v939_v15 }
 0x11a   :  { %v921_v18 = vpop.f32.mrf.mxu0  ;;  %v942_v19 = vpop.f32.mrf.mxu1 }
 0x11b   :  { %v511_v25 = vadd.f32 %v941_v24, %v471_v23 }
 0x11c   :  { %v943_v20 = vpop.f32.mrf.mxu1 }
 0x134   :  { %v550_v26 = vpop.f32.mrf.mxu0 }
 0x135   :  { %v551_v27 = vadd.f32 %v550_v26, %v511_v25 }
 0x136   :  { %v1023_v28 = vpop.f32.mrf.mxu0 }
 0x137   :  { %1058 = vmatmul.mubr.f32.vlgmr.msra.gmra.mxu1 %v551_v27 }
 0x138   :  { %v553_v29 = vpop.f32.mrf.mxu0  ;;  %1127 = vmatprep.mubr.msk.f32.mxu1 %vm1284_vm0, %v1283_v35  ;;  %1096 = vmatpush3.msra.mxu1 %v759_v34 }
 0x139   :  { %1097 = vmatprep.subr.mxu1 %v1283_v35 }
 0x13a   :  { %v1024_v30 = vpop.f32.mrf.mxu0  ;;  %1098 = vmatpush3.msra.mxu1 %v758_v36 }
 0x13b   :  { %1099 = vmatprep.subr.mxu1 %v1283_v35 }
 0x13c   :  { %1100 = vmatpush3.msra.mxu1 %v757_v37 }
 0x13d   :  { %1101 = vmatprep.subr.mxu1 %v1283_v35 }
 0x13e   :  { %1102 = vmatpush3.msra.mxu1 %v756_v38 }
 0x13f   :  { %1103 = vmatprep.subr.mxu1 %v1283_v35 }
 0x140   :  { %1104 = vmatpush3.msra.mxu1 %v755_v39 }
 0x141   :  { %1105 = vmatprep.subr.mxu1 %v1283_v35 }
 0x142   :  { %1106 = vmatpush3.msra.mxu1 %v754_v40 }
 0x143   :  { %1107 = vmatprep.subr.mxu1 %v1283_v35 }
 0x144   :  { %1108 = vmatpush3.msra.mxu1 %v753_v41 }
 0x145   :  { %1109 = vmatprep.subr.mxu1 %v1283_v35 }
 0x146   :  { %1110 = vmatpush3.msra.mxu1 %v752_v42 }
 0x147   :  { %1111 = vmatprep.subr.mxu1 %v1283_v35 }
 0x148   :  { %1112 = vmatpush3.msra.mxu1 %v751_v43 }
 0x149   :  { %1113 = vmatprep.subr.mxu1 %v1283_v35 }
 0x14a   :  { %1114 = vmatpush3.msra.mxu1 %v750_v44 }
 0x14b   :  { %1115 = vmatprep.subr.mxu1 %v1283_v35 }
 0x14c   :  { %1116 = vmatpush3.msra.mxu1 %v749_v45 }
 0x14d   :  { %1117 = vmatprep.subr.mxu1 %v1283_v35 }
 0x14e   :  { %1118 = vmatpush3.msra.mxu1 %v748_v46 }
 0x14f   :  { %1119 = vmatprep.subr.mxu1 %v1283_v35 }
 0x150   :  { %1120 = vmatpush3.msra.mxu1 %v747_v47 }
 0x151   :  { %1121 = vmatprep.subr.mxu1 %v1283_v35 }
 0x152   :  { %1122 = vmatpush3.msra.mxu1 %v746_v53 }
 0x153   :  { %1123 = vmatprep.subr.mxu1 %v1283_v35 }
 0x154   :  { %1124 = vmatpush3.msra.mxu1 %v745_v54 }
 0x155   :  { %1125 = vmatprep.subr.mxu1 %v1283_v35 }
 0x156   :  { %1126 = vmatpush3.msra.mxu1 %v744_v55 }
 0x1f7   :  { %v645_v49 = vpop.f32.mrf.mxu1 }
 0x1f8   :  { %v646_v50 = vadd.f32 %v897_v48, %v645_v49 }
 0x1f9   :  { %v1059_v51 = vpop.f32.mrf.mxu1 }
 0x1fa   :  { %v649_v52 = vmax.f32 %v646_v50, 0.0 }
 0x1fc   :  { %1093 = vmatmul.mubr.f32.vlgmr.msra.gmra.mxu0 %v649_v52 }
 0x2bc   :  { %v739_v57 = vpop.f32.mrf.mxu0 }
 0x2bd   :  { %v740_v58 = vadd.f32 %v898_v56, %v739_v57 }
 0x2be   :  { %v1094_v59 = vpop.f32.mrf.mxu0 }
 0x2bf   :  { %v743_v60 = vmax.f32 %v740_v58, 0.0 }
 0x2c1   :  { %1128 = vmatmul.mubr.f32.vlgmr.msra.gmra.mxu1 %v743_v60 }
 0x381   :  { %v833_v62 = vpop.f32.mrf.mxu1 }
 0x382   :  { %v834_v63 = vadd.f32 %v899_v61, %v833_v62 }
 0x383   :  { %v1129_v0 = vpop.f32.mrf.mxu1 }
 0x384   :  { %v900_v1 = vmul.f32 -1.442695, %v834_v63 }
 0x386   :  { %1185 = vpow2.f32 %v900_v1 }
 0x393   :  { %v1186_v35 = vpop.eup %1185 }
 0x394   :  { %v840_v2 = vadd.f32 1.0, %v1186_v35 }
 0x396   :  { %1187 = vrcp.f32 %v840_v2 }
 0x3a3   :  { %v1188_v3 = vpop.eup %1187 }
 0x3a4   :  { %843 = vst [vmem:[%s1453_s9] sm:$0xff] %v1188_v3 }
 0x3a5   :  { %848 = vsyncpa [#allocation3], 1 }
 0x3a6   :  { %849 = vsyncpa [#allocation5], 1 }
 0x3a7   :  { %850 = vsyncpa [#allocation8], 1 }

</bundles_post_ra>
